<compile_context>
chip_gen: v5e
topology: v5e:2x2
jax: 0.10.0
libtpu: 0.0.40
codegen_flags: <defaults>
</compile_context>

<pallas_src>
import functools

import jax
import jax.numpy as jnp
import numpy as np
from jax.experimental import pallas as pl
from jax.experimental.pallas import tpu as pltpu


def _upsample_conv_kernel(x_ref, w_ref, b_ref, rep_ref, o_ref):
    # x_ref:   (B, Cin, H*W)        B images, NCHW with spatial flattened
    # w_ref:   (tCo, Cin)  bf16     1x1 conv weight with BN scale folded in
    # b_ref:   (tCo, 1)    f32      folded BatchNorm bias
    # rep_ref: (g*W, 4*g*W) f32     exact 0/1 row-group upsample matrix
    # o_ref:   (B, tCo, 4*H*W)      upsampled output, NCHW flattened
    n_imgs = x_ref.shape[0]
    gcols_in = rep_ref.shape[0]           # g*W   input lanes per row group
    gcols_out = rep_ref.shape[1]          # 4*g*W output lanes per row group
    n_groups = x_ref.shape[2] // gcols_in

    w = w_ref[...]                        # bf16 (tCo, Cin)
    bias = b_ref[...]                     # f32  (tCo, 1)
    rep = rep_ref[...]                    # f32  (g*W, 4*g*W)

    for b in range(n_imgs):               # static unroll (small by construction)
        for gi in range(n_groups):
            i0 = gi * gcols_in
            q0 = gi * gcols_out
            xs = x_ref[b, :, i0:i0 + gcols_in]                 # (Cin, g*W)
            # 1x1 conv (+ folded BN scale): bf16 operands, f32 accumulate (MXU).
            y = jnp.dot(w, xs.astype(w.dtype),
                        preferred_element_type=jnp.float32)     # (tCo, g*W)
            y = y + bias                                        # folded BN bias
            y = jnp.where(y > 0, y, 0.1 * y)                    # LeakyReLU(0.1)
            # Exact 2x nearest upsample of this row group: 0/1 matrix, f32,
            # so output values equal y bit-exactly.
            z = jnp.dot(y, rep, preferred_element_type=jnp.float32)  # (tCo, 4gW)
            o_ref[b, :, q0:q0 + gcols_out] = z.astype(o_ref.dtype)


@functools.lru_cache(maxsize=None)
def _replication_matrix_np(g, w):
    """(g*W, 4*g*W) 0/1 matrix mapping g flattened input rows to the 2g
    flattened, column-duplicated output rows of a 2x nearest upsample."""
    q = np.arange(4 * g * w)
    h2 = q // (2 * w)                      # output row within the group [0, 2g)
    w2 = q % (2 * w)                       # output column               [0, 2W)
    src = (h2 // 2) * w + (w2 // 2)        # flattened input pixel feeding q
    return (src[None, :] == np.arange(g * w)[:, None]).astype(np.float32)


def upsample_forward(x_nchw, params, *, images_per_step=None, block_cout=None):
    """Forward pass of `Upsample` (inference semantics for BatchNorm)."""
    n, cin, h, w = x_nchw.shape
    cout = params["conv_w"].shape[0]
    hw, hw4 = h * w, 4 * h * w
    itemsize = x_nchw.dtype.itemsize

    # --- Fold BatchNorm into the conv: scale into the weight, bias separate.
    scale = params["bn_gamma"] / jnp.sqrt(params["bn_var"] + params["bn_eps"])
    bias = (params["bn_beta"] - params["bn_mean"] * scale).reshape(cout, 1)
    w_fold = params["conv_w"][:, :, 0, 0] * scale[:, None]     # (Cout, Cin) f32
    w_bf = w_fold.astype(jnp.bfloat16)                         # MXU operand

    # --- Row-group size g: largest divisor of H with g*W <= 128 lanes.
    g = 1
    for cand in range(1, h + 1):
        if h % cand == 0 and cand * w <= 128:
            g = cand
    gcols, gcols_out = g * w, 4 * g * w
    n_groups = h // g
    rep = jnp.asarray(_replication_matrix_np(g, w))            # f32 (gW, 4gW)

    # --- Cout blocking: two parallel blocks (keeps v7x's 2nd core busy at N=1)
    # whenever Cout tiles cleanly into multiples of 8.
    if block_cout is None:
        block_cout = cout // 2 if (cout % 16 == 0) else cout
    assert cout % block_cout == 0
    n_co = cout // block_cout

    # --- Images per grid step: amortize ~0.35us/step overhead, bounded by a
    # small VMEM budget and by unrolled-loop size.
    if images_per_step is None:
        budget = 4 * 2 ** 20
        per_img = (cin * hw + block_cout * hw4) * itemsize * 2
        images_per_step = 1
        for cand in range(1, n + 1):
            if n % cand == 0 and cand * per_img <= budget and cand * n_groups <= 32:
                images_per_step = cand
    b_imgs = images_per_step
    assert n % b_imgs == 0
    n_steps = n // b_imgs

    x_flat = x_nchw.reshape(n, cin, hw)            # free reshape (contiguous)

    # --- Scoped-VMEM limit sized from the real block footprint (+ margin).
    vmem_need = 2 * (b_imgs * cin * hw * itemsize          # x block (dbl buf)
                     + b_imgs * block_cout * hw4 * itemsize  # out block
                     + block_cout * cin * 2                  # bf16 weight
                     + block_cout * 4                        # bias
                     + gcols * gcols_out * 4)                # rep matrix
    vmem_limit = int(min(100 * 2 ** 20, max(4 * vmem_need, 16 * 2 ** 20)))

    conv_flops = 2 * n * cout * cin * hw
    rep_flops = 2 * n * cout * hw * gcols_out
    bytes_accessed = (n * cin * hw * itemsize + cout * cin * 2 + cout * 4
                      + gcols * gcols_out * 4 + n * cout * hw4 * itemsize)

    out = pl.pallas_call(
        _upsample_conv_kernel,
        out_shape=jax.ShapeDtypeStruct((n, cout, hw4), x_nchw.dtype),
        grid_spec=pltpu.PrefetchScalarGridSpec(
            num_scalar_prefetch=0,
            grid=(n_steps, n_co),
            in_specs=[
                pl.BlockSpec((b_imgs, cin, hw), lambda bi, co: (bi, 0, 0)),
                pl.BlockSpec((block_cout, cin), lambda bi, co: (co, 0)),
                pl.BlockSpec((block_cout, 1), lambda bi, co: (co, 0)),
                pl.BlockSpec((gcols, gcols_out), lambda bi, co: (0, 0)),
            ],
            out_specs=pl.BlockSpec((b_imgs, block_cout, hw4),
                                   lambda bi, co: (bi, co, 0)),
        ),
        compiler_params=pltpu.CompilerParams(
            dimension_semantics=("parallel", "parallel"),
            vmem_limit_bytes=vmem_limit),
        cost_estimate=pl.CostEstimate(flops=int(conv_flops + rep_flops),
                                      transcendentals=0,
                                      bytes_accessed=int(bytes_accessed)),
    )(x_flat, w_bf, bias, rep)

    # Free reshape: (N, Cout, 4HW) is exactly NCHW (N, Cout, 2H, 2W) memory.
    return out.reshape(n, cout, 2 * h, 2 * w)


def init_params(key, in_channels, out_channels):
    k1, k2, k3, k4, k5 = jax.random.split(key, 5)
    return {
        "conv_w": jax.random.normal(
            k1, (out_channels, in_channels, 1, 1), jnp.float32) * 0.1,
        "bn_gamma": jax.random.uniform(
            k2, (out_channels,), jnp.float32, 0.5, 1.5),
        "bn_beta": jax.random.normal(k3, (out_channels,), jnp.float32) * 0.1,
        "bn_mean": jax.random.normal(k4, (out_channels,), jnp.float32) * 0.1,
        "bn_var": jax.random.uniform(
            k5, (out_channels,), jnp.float32, 0.5, 1.5),
        "bn_eps": jnp.float32(1e-5),
    }


def _reference(x_nchw, params):
    """Pure-JAX reference (same math, NCHW, f32)."""
    scale = params["bn_gamma"] / jnp.sqrt(params["bn_var"] + params["bn_eps"])
    bias = params["bn_beta"] - params["bn_mean"] * scale
    w = params["conv_w"][:, :, 0, 0]  # (Cout, Cin)
    y = jnp.einsum("nchw,oc->nohw", x_nchw, w)
    y = y * scale[None, :, None, None] + bias[None, :, None, None]
    y = jnp.where(y > 0, y, 0.1 * y)
    return jnp.repeat(jnp.repeat(y, 2, axis=2), 2, axis=3)


if __name__ == "__main__":
    key = jax.random.PRNGKey(0)
    kx, kp = jax.random.split(key)
    in_channels, out_channels = 8, 4
    x = jax.random.normal(kx, (2, in_channels, 16, 16), jnp.float32)
    params = init_params(kp, in_channels, out_channels)

    out = jax.block_until_ready(upsample_forward(x, params))
    ref = _reference(x, params)

    assert out.shape == (2, out_channels, 32, 32), out.shape
    # bf16 MXU operands (per perf review) with f32 accumulation -> loose tol.
    assert jnp.allclose(out, ref, atol=2e-2, rtol=2e-2)
    print("KERNEL_OK")
</pallas_src>

<mosaic_0001>
module attributes {stable_mosaic.version = 11 : i64} {
  func.func @_upsample_conv_kernel(%arg0: i32, %arg1: i32, %arg2: memref<2x8x256xf32, #tpu.memory_space<vmem>>, %arg3: memref<4x8xbf16, #tpu.memory_space<vmem>>, %arg4: memref<4x1xf32, #tpu.memory_space<vmem>>, %arg5: memref<128x512xf32, #tpu.memory_space<vmem>>, %arg6: memref<2x4x1024xf32, #tpu.memory_space<vmem>>) attributes {dimension_semantics = [#tpu.dimension_semantics<parallel>, #tpu.dimension_semantics<parallel>], iteration_bounds = array<i64: 1, 1>, scalar_prefetch = 0 : i64, scratch_operands = 0 : i64, tpu.core_type = #tpu.core_type<tc>, window_params = [{transform_indices = @transform_0, window_bounds = array<i64: 2, 8, 256>}, {transform_indices = @transform_1, window_bounds = array<i64: 4, 8>}, {transform_indices = @transform_2, window_bounds = array<i64: 4, 1>}, {pipeline_mode = #tpu.pipeline_mode<synchronous>, transform_indices = @transform_3, window_bounds = array<i64: 128, 512>}, {transform_indices = @transform_4, window_bounds = array<i64: 2, 4, 1024>}]} {
    %c0 = arith.constant 0 : index
    %c0_0 = arith.constant 0 : index
    %0 = vector.load %arg3[%c0, %c0_0] : memref<4x8xbf16, #tpu.memory_space<vmem>>, vector<4x8xbf16>
    %c0_1 = arith.constant 0 : index
    %c0_2 = arith.constant 0 : index
    %1 = vector.load %arg4[%c0_1, %c0_2] : memref<4x1xf32, #tpu.memory_space<vmem>>, vector<4x1xf32>
    %c0_3 = arith.constant 0 : index
    %c0_4 = arith.constant 0 : index
    %2 = vector.load %arg5[%c0_3, %c0_4] : memref<128x512xf32, #tpu.memory_space<vmem>>, vector<128x512xf32>
    %c0_5 = arith.constant 0 : index
    %c0_6 = arith.constant 0 : index
    %c0_7 = arith.constant 0 : index
    %3 = vector.load %arg2[%c0_5, %c0_6, %c0_7] : memref<2x8x256xf32, #tpu.memory_space<vmem>>, vector<1x8x128xf32>
    %4 = vector.shape_cast %3 : vector<1x8x128xf32> to vector<8x128xf32>
    %5 = arith.truncf %4 : vector<8x128xf32> to vector<8x128xbf16>
    %cst = arith.constant dense<0.000000e+00> : vector<4x128xf32>
    %6 = tpu.matmul %0, %5, %cst {dimension_numbers = #tpu.dot_dimension_numbers<[1], [0], [0], [1], [0, 0, 1, 1], [], []>} : vector<4x8xbf16>, vector<8x128xbf16>, vector<4x128xf32> -> vector<4x128xf32>
    %7 = vector.broadcast %1 : vector<4x1xf32> to vector<4x128xf32>
    %8 = arith.addf %6, %7 : vector<4x128xf32>
    %cst_8 = arith.constant 0.000000e+00 : f32
    %9 = vector.broadcast %cst_8 : f32 to vector<4x128xf32>
    %10 = arith.cmpf ogt, %8, %9 : vector<4x128xf32>
    %cst_9 = arith.constant 1.000000e-01 : f32
    %11 = vector.broadcast %cst_9 : f32 to vector<4x128xf32>
    %12 = arith.mulf %11, %8 : vector<4x128xf32>
    %13 = arith.select %10, %8, %12 : vector<4x128xi1>, vector<4x128xf32>
    %cst_10 = arith.constant dense<0.000000e+00> : vector<4x512xf32>
    %14 = tpu.matmul %13, %2, %cst_10 {dimension_numbers = #tpu.dot_dimension_numbers<[1], [0], [0], [1], [0, 0, 1, 1], [], []>} : vector<4x128xf32>, vector<128x512xf32>, vector<4x512xf32> -> vector<4x512xf32>
    %c0_11 = arith.constant 0 : index
    %c0_12 = arith.constant 0 : index
    %c0_13 = arith.constant 0 : index
    %15 = vector.load %arg6[%c0_11, %c0_12, %c0_13] : memref<2x4x1024xf32, #tpu.memory_space<vmem>>, vector<1x4x512xf32>
    %16 = vector.shape_cast %15 : vector<1x4x512xf32> to vector<4x512xf32>
    %17 = vector.shape_cast %14 : vector<4x512xf32> to vector<1x4x512xf32>
    tpu.vector_store %arg6[%c0_11, %c0_12, %c0_13], %17 {strides = array<i32>} : memref<2x4x1024xf32, #tpu.memory_space<vmem>>, vector<1x4x512xf32>,
    %c0_14 = arith.constant 0 : index
    %c0_15 = arith.constant 0 : index
    %c128 = arith.constant 128 : index
    %18 = vector.load %arg2[%c0_14, %c0_15, %c128] : memref<2x8x256xf32, #tpu.memory_space<vmem>>, vector<1x8x128xf32>
    %19 = vector.shape_cast %18 : vector<1x8x128xf32> to vector<8x128xf32>
    %20 = arith.truncf %19 : vector<8x128xf32> to vector<8x128xbf16>
    %cst_16 = arith.constant dense<0.000000e+00> : vector<4x128xf32>
    %21 = tpu.matmul %0, %20, %cst_16 {dimension_numbers = #tpu.dot_dimension_numbers<[1], [0], [0], [1], [0, 0, 1, 1], [], []>} : vector<4x8xbf16>, vector<8x128xbf16>, vector<4x128xf32> -> vector<4x128xf32>
    %22 = vector.broadcast %1 : vector<4x1xf32> to vector<4x128xf32>
    %23 = arith.addf %21, %22 : vector<4x128xf32>
    %cst_17 = arith.constant 0.000000e+00 : f32
    %24 = vector.broadcast %cst_17 : f32 to vector<4x128xf32>
    %25 = arith.cmpf ogt, %23, %24 : vector<4x128xf32>
    %cst_18 = arith.constant 1.000000e-01 : f32
    %26 = vector.broadcast %cst_18 : f32 to vector<4x128xf32>
    %27 = arith.mulf %26, %23 : vector<4x128xf32>
    %28 = arith.select %25, %23, %27 : vector<4x128xi1>, vector<4x128xf32>
    %cst_19 = arith.constant dense<0.000000e+00> : vector<4x512xf32>
    %29 = tpu.matmul %28, %2, %cst_19 {dimension_numbers = #tpu.dot_dimension_numbers<[1], [0], [0], [1], [0, 0, 1, 1], [], []>} : vector<4x128xf32>, vector<128x512xf32>, vector<4x512xf32> -> vector<4x512xf32>
    %c0_20 = arith.constant 0 : index
    %c0_21 = arith.constant 0 : index
    %c512 = arith.constant 512 : index
    %30 = vector.load %arg6[%c0_20, %c0_21, %c512] : memref<2x4x1024xf32, #tpu.memory_space<vmem>>, vector<1x4x512xf32>
    %31 = vector.shape_cast %30 : vector<1x4x512xf32> to vector<4x512xf32>
    %32 = vector.shape_cast %29 : vector<4x512xf32> to vector<1x4x512xf32>
    tpu.vector_store %arg6[%c0_20, %c0_21, %c512], %32 {strides = array<i32>} : memref<2x4x1024xf32, #tpu.memory_space<vmem>>, vector<1x4x512xf32>,
    %c1 = arith.constant 1 : index
    %c0_22 = arith.constant 0 : index
    %c0_23 = arith.constant 0 : index
    %33 = vector.load %arg2[%c1, %c0_22, %c0_23] : memref<2x8x256xf32, #tpu.memory_space<vmem>>, vector<1x8x128xf32>
    %34 = vector.shape_cast %33 : vector<1x8x128xf32> to vector<8x128xf32>
    %35 = arith.truncf %34 : vector<8x128xf32> to vector<8x128xbf16>
    %cst_24 = arith.constant dense<0.000000e+00> : vector<4x128xf32>
    %36 = tpu.matmul %0, %35, %cst_24 {dimension_numbers = #tpu.dot_dimension_numbers<[1], [0], [0], [1], [0, 0, 1, 1], [], []>} : vector<4x8xbf16>, vector<8x128xbf16>, vector<4x128xf32> -> vector<4x128xf32>
    %37 = vector.broadcast %1 : vector<4x1xf32> to vector<4x128xf32>
    %38 = arith.addf %36, %37 : vector<4x128xf32>
    %cst_25 = arith.constant 0.000000e+00 : f32
    %39 = vector.broadcast %cst_25 : f32 to vector<4x128xf32>
    %40 = arith.cmpf ogt, %38, %39 : vector<4x128xf32>
    %cst_26 = arith.constant 1.000000e-01 : f32
    %41 = vector.broadcast %cst_26 : f32 to vector<4x128xf32>
    %42 = arith.mulf %41, %38 : vector<4x128xf32>
    %43 = arith.select %40, %38, %42 : vector<4x128xi1>, vector<4x128xf32>
    %cst_27 = arith.constant dense<0.000000e+00> : vector<4x512xf32>
    %44 = tpu.matmul %43, %2, %cst_27 {dimension_numbers = #tpu.dot_dimension_numbers<[1], [0], [0], [1], [0, 0, 1, 1], [], []>} : vector<4x128xf32>, vector<128x512xf32>, vector<4x512xf32> -> vector<4x512xf32>
    %c1_28 = arith.constant 1 : index
    %c0_29 = arith.constant 0 : index
    %c0_30 = arith.constant 0 : index
    %45 = vector.load %arg6[%c1_28, %c0_29, %c0_30] : memref<2x4x1024xf32, #tpu.memory_space<vmem>>, vector<1x4x512xf32>
    %46 = vector.shape_cast %45 : vector<1x4x512xf32> to vector<4x512xf32>
    %47 = vector.shape_cast %44 : vector<4x512xf32> to vector<1x4x512xf32>
    tpu.vector_store %arg6[%c1_28, %c0_29, %c0_30], %47 {strides = array<i32>} : memref<2x4x1024xf32, #tpu.memory_space<vmem>>, vector<1x4x512xf32>,
    %c1_31 = arith.constant 1 : index
    %c0_32 = arith.constant 0 : index
    %c128_33 = arith.constant 128 : index
    %48 = vector.load %arg2[%c1_31, %c0_32, %c128_33] : memref<2x8x256xf32, #tpu.memory_space<vmem>>, vector<1x8x128xf32>
    %49 = vector.shape_cast %48 : vector<1x8x128xf32> to vector<8x128xf32>
    %50 = arith.truncf %49 : vector<8x128xf32> to vector<8x128xbf16>
    %cst_34 = arith.constant dense<0.000000e+00> : vector<4x128xf32>
    %51 = tpu.matmul %0, %50, %cst_34 {dimension_numbers = #tpu.dot_dimension_numbers<[1], [0], [0], [1], [0, 0, 1, 1], [], []>} : vector<4x8xbf16>, vector<8x128xbf16>, vector<4x128xf32> -> vector<4x128xf32>
    %52 = vector.broadcast %1 : vector<4x1xf32> to vector<4x128xf32>
    %53 = arith.addf %51, %52 : vector<4x128xf32>
    %cst_35 = arith.constant 0.000000e+00 : f32
    %54 = vector.broadcast %cst_35 : f32 to vector<4x128xf32>
    %55 = arith.cmpf ogt, %53, %54 : vector<4x128xf32>
    %cst_36 = arith.constant 1.000000e-01 : f32
    %56 = vector.broadcast %cst_36 : f32 to vector<4x128xf32>
    %57 = arith.mulf %56, %53 : vector<4x128xf32>
    %58 = arith.select %55, %53, %57 : vector<4x128xi1>, vector<4x128xf32>
    %cst_37 = arith.constant dense<0.000000e+00> : vector<4x512xf32>
    %59 = tpu.matmul %58, %2, %cst_37 {dimension_numbers = #tpu.dot_dimension_numbers<[1], [0], [0], [1], [0, 0, 1, 1], [], []>} : vector<4x128xf32>, vector<128x512xf32>, vector<4x512xf32> -> vector<4x512xf32>
    %c1_38 = arith.constant 1 : index
    %c0_39 = arith.constant 0 : index
    %c512_40 = arith.constant 512 : index
    %60 = vector.load %arg6[%c1_38, %c0_39, %c512_40] : memref<2x4x1024xf32, #tpu.memory_space<vmem>>, vector<1x4x512xf32>
    %61 = vector.shape_cast %60 : vector<1x4x512xf32> to vector<4x512xf32>
    %62 = vector.shape_cast %59 : vector<4x512xf32> to vector<1x4x512xf32>
    tpu.vector_store %arg6[%c1_38, %c0_39, %c512_40], %62 {strides = array<i32>} : memref<2x4x1024xf32, #tpu.memory_space<vmem>>, vector<1x4x512xf32>,
    return
  }
  func.func @transform_0(%arg0: i32, %arg1: i32) -> (i32, i32, i32) {
    %c0_i32 = arith.constant 0 : i32
    %c0_i32_0 = arith.constant 0 : i32
    %c0_i32_1 = arith.constant 0 : i32
    return %arg0, %c0_i32, %c0_i32_0 : i32, i32, i32
  }
  func.func @transform_1(%arg0: i32, %arg1: i32) -> (i32, i32) {
    %c0_i32 = arith.constant 0 : i32
    %c0_i32_0 = arith.constant 0 : i32
    return %arg1, %c0_i32 : i32, i32
  }
  func.func @transform_2(%arg0: i32, %arg1: i32) -> (i32, i32) {
    %c0_i32 = arith.constant 0 : i32
    %c0_i32_0 = arith.constant 0 : i32
    return %arg1, %c0_i32 : i32, i32
  }
  func.func @transform_3(%arg0: i32, %arg1: i32) -> (i32, i32) {
    %c0_i32 = arith.constant 0 : i32
    %c0_i32_0 = arith.constant 0 : i32
    %c0_i32_1 = arith.constant 0 : i32
    return %c0_i32, %c0_i32_0 : i32, i32
  }
  func.func @transform_4(%arg0: i32, %arg1: i32) -> (i32, i32, i32) {
    %c0_i32 = arith.constant 0 : i32
    %c0_i32_0 = arith.constant 0 : i32
    return %arg0, %arg1, %c0_i32 : i32, i32, i32
  }
}

</mosaic_0001>

<bundles_post_ra>
// kernel: tpu_custom_call.1
= control target key start
LH: loop header
LB: loop body
LE: loop exit
PB: predicated region body
PF: predicated region fallthrough
CT: control target
= control target key end

     0   :  { %9 = vsyncpa [#allocation3], 0  ;;  %s1158_s0 = inlined_call_operand.hbm [shape: f32[2,8,256], index: 0, kind: input, shape index: {}]   ;;  %s1159_s1 = inlined_call_operand.vmem [shape: bf16[4,8], index: 1, kind: input, shape index: {}]   ;;  %s1160_s2 = inlined_call_operand.vmem [shape: f32[4,1], index: 2, kind: input, shape index: {}]   ;;  %s1161_s3 = inlined_call_operand.hbm [shape: f32[128,512], index: 3, kind: input, shape index: {}]   ;;  %s1162_s4 = inlined_call_operand.hbm [shape: f32[2,4,1024], index: 4, kind: output, shape index: {}]  }
   0x1   :  { %10 = vsyncpa [#allocation6], 0 }
   0x2   :  { %11 = vsyncpa [#allocation4], 0  ;;  %s16_s17 = sshll.u32 %s1158_s0, 4  ;;  %s692_s18 = smov [#allocation2]   ;;  %s17_s17 = int_to_ptr.hbm [resolvable:$true] %s16_s17 }
   0x3   :  { %s18_s19 = sshll.u32 %s692_s18, 4  ;;  %s33_s22 = sshll.u32 %s1161_s3, 4  ;;  %s19_s19 = int_to_ptr.vmem [resolvable:$true] %s18_s19  ;;  %s34_s22 = int_to_ptr.hbm [resolvable:$true] %s33_s22 }
   0x4   :  { %s693_s23 = smov 256   ;;  %s694_s24 = smov 16  }
   0x5   :  { %24 = dma.hbm_to_vmem [thread:$0]  %s17_s17, 512, %s19_s19, [#allocation3], %s693_s23, %s693_s23, %s694_s24  }
   0x6   :  { %s695_s25 = smov [#allocation5]   ;;  %s696_s27 = smov 512  }
   0x7   :  { %s35_s26 = sshll.u32 %s695_s25, 4  ;;  %s697_s28 = smov 32   ;;  %s36_s26 = int_to_ptr.vmem [resolvable:$true] %s35_s26 }
   0x8   :  { %41 = dma.hbm_to_vmem [thread:$0]  %s34_s22, 8192, %s36_s26, [#allocation6], %s696_s27, %s696_s27, %s697_s28  }
   0x9   :  { %686 = dma.done.wait [#allocation3], 512  }
   0xa   :  { %687 = vsyncadd [#allocation3], 4294966784 }
   0xb   :  { %688 = dma.done.wait [#allocation6], 8192  }
   0xc   :  { %689 = vsyncadd [#allocation6], 4294959104  ;;  %v698_v0 = vmov 0   ;;  %v117_v1 = vld [vmem:[#allocation2] sm:$0xff]  ;;  %vm128_vm0 = vcmask 1043456   ;;  %v739_v5 = vld [vmem:[#allocation5 + $0x1e8] sm:$0xff] }
   0xd   :  { %613 = vset.pattern.permute.xlu0 %v698_v0  ;;  %v52_v2 = vld [vmem:[%s1160_s2] sm:$0xf]  ;;  %v118_v3 = vpack.c.bf16 %v117_v1, %v117_v1  ;;  %v741_v6 = vld [vmem:[#allocation5 + $0x1f0] sm:$0xff]  ;;  %168 = vmatpush.msra.mxu2 %v739_v5  ;;  %v745_v7 = vld [vmem:[#allocation5 + $0x1f8] sm:$0xff]  ;;  %vm124_vm1 = vcmask 64512   ;;  %s587_s7 = sshll.u32 %s1162_s4, 4  ;;  %s588_s7 = int_to_ptr.hbm [resolvable:$true] %s587_s7 }
   0xe   :  { %121 = vperm.xlu0 %613, %v52_v2   ;;  %v737_v4 = vld [vmem:[#allocation5 + $0x1e0] sm:$0xff]  ;;  %1189 = vst [vmem:[#allocation11_spill] sm:$0xff] %v741_v6  ;;  %v749_v9 = vld [vmem:[#allocation5 + $0x1c8] sm:$0xff]  ;;  %188 = vmatpush.msra.mxu3 %v741_v6  ;;  %v753_v11 = vld [vmem:[#allocation5 + $0x1d0] sm:$0xff] }
   0xf   :  { %148 = vmatpush.msra.mxu1 %v737_v4  ;;  %v747_v8 = vld [vmem:[#allocation5 + $0x1c0] sm:$0xff]  ;;  %v130_v10 = vsel %vm128_vm0, %v118_v3, 0  ;;  %v763_v14 = vld [vmem:[#allocation5 + $0x1a8] sm:$0xff]  ;;  %169 = vmatpush.msra.mxu2 %v749_v9  ;;  %v767_v15 = vld [vmem:[#allocation5 + $0x1d8] sm:$0xff] }
  0x10   :  { %v755_v12 = vld [vmem:[#allocation5 + $0x1a0] sm:$0xff]  ;;  %139 = vmatpush.bf16.msra.mxu0 %v130_v10  ;;  %v769_v16 = vld [vmem:[#allocation5 + $0x1b0] sm:$0xff]  ;;  %189 = vmatpush.msra.mxu3 %v753_v11  ;;  %v775_v18 = vld [vmem:[#allocation5 + $0x188] sm:$0xff] }
  0x11   :  { %v760_v13 = vld [vmem:[%s1159_s1] sm:$0x3]  ;;  %149 = vmatpush.msra.mxu1 %v747_v8  ;;  %1190 = vst [vmem:[#allocation12_spill] sm:$0xff] %v769_v16  ;;  %170 = vmatpush.msra.mxu2 %v763_v14  ;;  %v780_v19 = vld [vmem:[#allocation5 + $0x1b8] sm:$0xff]  ;;  %v782_v20 = vld [vmem:[#allocation5 + $0x190] sm:$0xff]  ;;  %s699_s1 = smov [#allocation7]  }
  0x12   :  { %v773_v17 = vld [vmem:[#allocation5 + $0x180] sm:$0xff]  ;;  %1191 = vst [vmem:[#allocation13_spill] sm:$0xff] %v782_v20  ;;  %190 = vmatpush.msra.mxu3 %v769_v16  ;;  %v788_v22 = vld [vmem:[#allocation5 + $0x168] sm:$0xff]  ;;  %v792_v23 = vld [vmem:[#allocation5 + $0x198] sm:$0xff]  ;;  %s585_s30 = sshll.u32 %s699_s1, 4  ;;  %s586_s30 = int_to_ptr.vmem [resolvable:$true] %s585_s30 }
  0x13   :  { %150 = vmatpush.msra.mxu1 %v755_v12  ;;  %601 = vmatmul.msk.bf16.vlgmr.msra.gmra.mxu0 %vm124_vm1, %v760_v13  ;;  %v786_v21 = vld [vmem:[#allocation5 + $0x160] sm:$0xff]  ;;  %v794_v24 = vld [vmem:[#allocation5 + $0x170] sm:$0xff]  ;;  %v800_v26 = vld [vmem:[#allocation5 + $0x148] sm:$0xff] }
  0x14   :  { %208 = vmatpush.msrb.mxu0 %v745_v7  ;;  %171 = vmatpush.msra.mxu2 %v775_v18  ;;  %1192 = vst [vmem:[#allocation14_spill] sm:$0xff] %v794_v24  ;;  %v798_v25 = vld [vmem:[#allocation5 + $0x140] sm:$0xff]  ;;  %v804_v27 = vld [vmem:[#allocation5 + $0x178] sm:$0xff]  ;;  %v806_v28 = vld [vmem:[#allocation5 + $0x150] sm:$0xff] }
  0x15   :  { %151 = vmatpush.msra.mxu1 %v773_v17  ;;  %191 = vmatpush.msra.mxu3 %v782_v20  ;;  %1193 = vst [vmem:[#allocation15_spill] sm:$0xff] %v806_v28  ;;  %v810_v29 = vld [vmem:[#allocation5 + $0x120] sm:$0xff]  ;;  %v812_v30 = vld [vmem:[#allocation5 + $0x128] sm:$0xff]  ;;  %v816_v31 = vld [vmem:[#allocation5 + $0x158] sm:$0xff] }
  0x16   :  { %209 = vmatpush.msrb.mxu0 %v767_v15  ;;  %172 = vmatpush.msra.mxu2 %v788_v22  ;;  %v818_v32 = vld [vmem:[#allocation5 + $0x130] sm:$0xff]  ;;  %v822_v33 = vld [vmem:[#allocation5 + $0x100] sm:$0xff]  ;;  %v824_v34 = vld [vmem:[#allocation5 + $0x108] sm:$0xff] }
  0x17   :  { %152 = vmatpush.msra.mxu1 %v786_v21  ;;  %192 = vmatpush.msra.mxu3 %v794_v24  ;;  %1194 = vst [vmem:[#allocation16_spill] sm:$0xff] %v818_v32  ;;  %v828_v35 = vld [vmem:[#allocation5 + $0x138] sm:$0xff]  ;;  %v830_v36 = vld [vmem:[#allocation5 + $0x110] sm:$0xff]  ;;  %v834_v37 = vld [vmem:[#allocation5 + $0xe0] sm:$0xff] }
  0x18   :  { %210 = vmatpush.msrb.mxu0 %v780_v19  ;;  %173 = vmatpush.msra.mxu2 %v800_v26  ;;  %1195 = vst [vmem:[#allocation17_spill] sm:$0xff] %v830_v36  ;;  %v836_v38 = vld [vmem:[#allocation5 + $0xe8] sm:$0xff]  ;;  %v840_v39 = vld [vmem:[#allocation5 + $0x118] sm:$0xff]  ;;  %v842_v40 = vld [vmem:[#allocation5 + $0xf0] sm:$0xff] }
  0x19   :  { %153 = vmatpush.msra.mxu1 %v798_v25  ;;  %193 = vmatpush.msra.mxu3 %v806_v28  ;;  %1196 = vst [vmem:[#allocation18_spill] sm:$0xff] %v842_v40  ;;  %v846_v41 = vld [vmem:[#allocation5 + $0xc0] sm:$0xff]  ;;  %v848_v42 = vld [vmem:[#allocation5 + $0xc8] sm:$0xff]  ;;  %v852_v43 = vld [vmem:[#allocation5 + $0xf8] sm:$0xff] }
  0x1a   :  { %211 = vmatpush.msrb.mxu0 %v792_v23  ;;  %174 = vmatpush.msra.mxu2 %v812_v30  ;;  %v854_v44 = vld [vmem:[#allocation5 + $0xd0] sm:$0xff]  ;;  %v858_v45 = vld [vmem:[#allocation5 + $0xa0] sm:$0xff]  ;;  %v860_v46 = vld [vmem:[#allocation5 + $0xa8] sm:$0xff] }
  0x1b   :  { %154 = vmatpush.msra.mxu1 %v810_v29  ;;  %194 = vmatpush.msra.mxu3 %v818_v32  ;;  %1197 = vst [vmem:[#allocation19_spill] sm:$0xff] %v854_v44  ;;  %v864_v47 = vld [vmem:[#allocation5 + $0xd8] sm:$0xff]  ;;  %v866_v48 = vld [vmem:[#allocation5 + $0xb0] sm:$0xff]  ;;  %v870_v49 = vld [vmem:[#allocation5 + $0x80] sm:$0xff] }
  0x1c   :  { %212 = vmatpush.msrb.mxu0 %v804_v27  ;;  %175 = vmatpush.msra.mxu2 %v824_v34  ;;  %1198 = vst [vmem:[#allocation20_spill] sm:$0xff] %v866_v48  ;;  %v872_v50 = vld [vmem:[#allocation5 + $0x88] sm:$0xff]  ;;  %v876_v51 = vld [vmem:[#allocation5 + $0xb8] sm:$0xff]  ;;  %v878_v52 = vld [vmem:[#allocation5 + $0x90] sm:$0xff] }
  0x1d   :  { %155 = vmatpush.msra.mxu1 %v822_v33  ;;  %195 = vmatpush.msra.mxu3 %v830_v36  ;;  %1199 = vst [vmem:[#allocation21_spill] sm:$0xff] %v878_v52  ;;  %v882_v53 = vld [vmem:[#allocation5 + $0x60] sm:$0xff]  ;;  %v884_v54 = vld [vmem:[#allocation5 + $0x68] sm:$0xff]  ;;  %v888_v55 = vld [vmem:[#allocation5 + $0x98] sm:$0xff] }
  0x1e   :  { %213 = vmatpush.msrb.mxu0 %v816_v31  ;;  %176 = vmatpush.msra.mxu2 %v836_v38  ;;  %1200 = vst [vmem:[#allocation22_spill] sm:$0xff] %v888_v55  ;;  %v890_v56 = vld [vmem:[#allocation5 + $0x70] sm:$0xff]  ;;  %v896_v57 = vld [vmem:[#allocation5 + $0x78] sm:$0xff]  ;;  %v901_v58 = vld [vmem:[#allocation5 + $0x40] sm:$0xff] }
  0x1f   :  { %156 = vmatpush.msra.mxu1 %v834_v37  ;;  %196 = vmatpush.msra.mxu3 %v842_v40  ;;  %1201 = vst [vmem:[#allocation23_spill] sm:$0xff] %v890_v56  ;;  %v903_v59 = vld [vmem:[#allocation5 + $0x48] sm:$0xff]  ;;  %v905_v60 = vld [vmem:[#allocation5 + $0x50] sm:$0xff]  ;;  %v909_v61 = vld [vmem:[#allocation5 + $0x58] sm:$0xff] }
  0x20   :  { %214 = vmatpush.msrb.mxu0 %v828_v35  ;;  %177 = vmatpush.msra.mxu2 %v848_v42  ;;  %1202 = vst [vmem:[#allocation24_spill] sm:$0xff] %v896_v57  ;;  %v913_v62 = vld [vmem:[#allocation5 + $0x20] sm:$0xff]  ;;  %v915_v63 = vld [vmem:[#allocation5 + $0x28] sm:$0xff]  ;;  %v917_v0 = vld [vmem:[#allocation5 + $0x30] sm:$0xff] }
  0x21   :  { %157 = vmatpush.msra.mxu1 %v846_v41  ;;  %197 = vmatpush.msra.mxu3 %v854_v44  ;;  %1203 = vst [vmem:[#allocation25_spill] sm:$0xff] %v905_v60  ;;  %v921_v1 = vld [vmem:[#allocation5 + $0x38] sm:$0xff]  ;;  %v923_v2 = vld [vmem:[#allocation5] sm:$0xff]  ;;  %v925_v3 = vld [vmem:[#allocation5 + $0x8] sm:$0xff] }
  0x22   :  { %215 = vmatpush.msrb.mxu0 %v840_v39  ;;  %178 = vmatpush.msra.mxu2 %v860_v46  ;;  %1204 = vst [vmem:[#allocation26_spill] sm:$0xff] %v909_v61  ;;  %v929_v10 = vld [vmem:[#allocation5 + $0x10] sm:$0xff] }
  0x23   :  { %158 = vmatpush.msra.mxu1 %v858_v45  ;;  %198 = vmatpush.msra.mxu3 %v866_v48  ;;  %1205 = vst [vmem:[#allocation27_spill] sm:$0xff] %v917_v0 }
  0x24   :  { %216 = vmatpush.msrb.mxu0 %v852_v43  ;;  %179 = vmatpush.msra.mxu2 %v872_v50  ;;  %1206 = vst [vmem:[#allocation28_spill] sm:$0xff] %v921_v1 }
  0x25   :  { %159 = vmatpush.msra.mxu1 %v870_v49  ;;  %199 = vmatpush.msra.mxu3 %v878_v52  ;;  %1207 = vst [vmem:[#allocation29_spill] sm:$0xff] %v925_v3 }
  0x26   :  { %217 = vmatpush.msrb.mxu0 %v864_v47  ;;  %180 = vmatpush.msra.mxu2 %v884_v54  ;;  %1208 = vst [vmem:[#allocation30_spill] sm:$0xff] %v929_v10 }
  0x27   :  { %160 = vmatpush.msra.mxu1 %v882_v53  ;;  %200 = vmatpush.msra.mxu3 %v890_v56 }
  0x28   :  { %218 = vmatpush.msrb.mxu0 %v876_v51  ;;  %181 = vmatpush.msra.mxu2 %v903_v59 }
  0x29   :  { %161 = vmatpush.msra.mxu1 %v901_v58  ;;  %201 = vmatpush.msra.mxu3 %v905_v60 }
  0x2a   :  { %219 = vmatpush.msrb.mxu0 %v888_v55  ;;  %182 = vmatpush.msra.mxu2 %v915_v63 }
  0x2b   :  { %162 = vmatpush.msra.mxu1 %v913_v62  ;;  %202 = vmatpush.msra.mxu3 %v917_v0 }
  0x2c   :  { %220 = vmatpush.msrb.mxu0 %v896_v57  ;;  %183 = vmatpush.msra.mxu2 %v925_v3  ;;  %v240_v57 = vld [vmem:[#allocation2 + $0x8] sm:$0xff] }
  0x2d   :  { %163 = vmatpush.msra.mxu1 %v923_v2  ;;  %203 = vmatpush.msra.mxu3 %v929_v10  ;;  %v241_v55 = vpack.c.bf16 %v240_v57, %v240_v57 }
  0x2e   :  { %221 = vmatpush.msrb.mxu0 %v909_v61  ;;  %v931_v61 = vld [vmem:[#allocation5 + $0x18] sm:$0xff]  ;;  %261 = vmatpush.msrb.mxu2 %v737_v4 }
  0x2f   :  { %281 = vmatpush.msrb.mxu3 %v739_v5 }
  0x30   :  { %222 = vmatpush.msrb.mxu0 %v921_v1  ;;  %262 = vmatpush.msrb.mxu2 %v747_v8  ;;  %v243_v1 = vsel %vm128_vm0, %v241_v55, 0 }
  0x31   :  { %282 = vmatpush.msrb.mxu3 %v749_v9  ;;  %252 = vmatpush.bf16.msrb.mxu1 %v243_v1 }
  0x32   :  { %223 = vmatpush.msrb.mxu0 %v931_v61  ;;  %263 = vmatpush.msrb.mxu2 %v755_v12 }
  0x33   :  { %283 = vmatpush.msrb.mxu3 %v763_v14 }
  0x34   :  { %301 = vmatpush.msra.mxu0 %v741_v6  ;;  %264 = vmatpush.msrb.mxu2 %v773_v17 }
  0x35   :  { %284 = vmatpush.msrb.mxu3 %v775_v18 }
  0x36   :  { %302 = vmatpush.msra.mxu0 %v753_v11  ;;  %265 = vmatpush.msrb.mxu2 %v786_v21 }
  0x37   :  { %285 = vmatpush.msrb.mxu3 %v788_v22 }
  0x38   :  { %303 = vmatpush.msra.mxu0 %v769_v16  ;;  %266 = vmatpush.msrb.mxu2 %v798_v25 }
  0x39   :  { %286 = vmatpush.msrb.mxu3 %v800_v26 }
  0x3a   :  { %304 = vmatpush.msra.mxu0 %v782_v20  ;;  %267 = vmatpush.msrb.mxu2 %v810_v29 }
  0x3b   :  { %287 = vmatpush.msrb.mxu3 %v812_v30 }
  0x3c   :  { %305 = vmatpush.msra.mxu0 %v794_v24  ;;  %268 = vmatpush.msrb.mxu2 %v822_v33 }
  0x3d   :  { %288 = vmatpush.msrb.mxu3 %v824_v34 }
  0x3e   :  { %306 = vmatpush.msra.mxu0 %v806_v28  ;;  %269 = vmatpush.msrb.mxu2 %v834_v37 }
  0x3f   :  { %289 = vmatpush.msrb.mxu3 %v836_v38 }
  0x40   :  { %307 = vmatpush.msra.mxu0 %v818_v32  ;;  %270 = vmatpush.msrb.mxu2 %v846_v41 }
  0x41   :  { %290 = vmatpush.msrb.mxu3 %v848_v42 }
  0x42   :  { %308 = vmatpush.msra.mxu0 %v830_v36  ;;  %271 = vmatpush.msrb.mxu2 %v858_v45 }
  0x43   :  { %291 = vmatpush.msrb.mxu3 %v860_v46 }
  0x44   :  { %309 = vmatpush.msra.mxu0 %v842_v40  ;;  %272 = vmatpush.msrb.mxu2 %v870_v49 }
  0x45   :  { %292 = vmatpush.msrb.mxu3 %v872_v50 }
  0x46   :  { %310 = vmatpush.msra.mxu0 %v854_v44  ;;  %273 = vmatpush.msrb.mxu2 %v882_v53 }
  0x47   :  { %293 = vmatpush.msrb.mxu3 %v884_v54 }
  0x48   :  { %311 = vmatpush.msra.mxu0 %v866_v48  ;;  %274 = vmatpush.msrb.mxu2 %v901_v58 }
  0x49   :  { %294 = vmatpush.msrb.mxu3 %v903_v59 }
  0x4a   :  { %312 = vmatpush.msra.mxu0 %v878_v52  ;;  %275 = vmatpush.msrb.mxu2 %v913_v62 }
  0x4b   :  { %295 = vmatpush.msrb.mxu3 %v915_v63 }
  0x4c   :  { %313 = vmatpush.msra.mxu0 %v890_v56  ;;  %276 = vmatpush.msrb.mxu2 %v923_v2 }
  0x4d   :  { %296 = vmatpush.msrb.mxu3 %v925_v3 }
  0x4e   :  { %314 = vmatpush.msra.mxu0 %v905_v60 }
  0x50   :  { %315 = vmatpush.msra.mxu0 %v917_v0 }
  0x52   :  { %316 = vmatpush.msra.mxu0 %v929_v10 }
  0x80   :  { %v972_v55 = vpop.permute.xlu0 %121 }
  0x90   :  { %v141_v57 = vpop.f32.mrf.mxu0 }
  0x91   :  { %v142_v1 = vadd.f32 %v141_v57, %v972_v55 }
  0x93   :  { %vm145_vm2 = vcmp.gt.f32.partialorder %v142_v1, 0.0  ;;  %v146_v48 = vmul.f32 0.1, %v142_v1 }
  0x95   :  { %v147_v52 = vsel %vm145_vm2, %v142_v1, %v146_v48  ;;  %v1209_v48 = vld [vmem:[#allocation22_spill] sm:$0xff] }
  0x96   :  { %164 = vmatmul.f32.vlgmr.msra.gmra.mxu1 %v147_v52  ;;  %184 = vmatmul.f32.vlgmr.msra.gmra.mxu2 %v147_v52  ;;  %v1211_v1 = vld [vmem:[#allocation26_spill] sm:$0xff] }
  0x97   :  { %204 = vmatmul.f32.vlgmr.msra.gmra.mxu3 %v147_v52  ;;  %224 = vmatmul.f32.vlgmr.msrb.gmra.mxu0 %v147_v52  ;;  %v1210_v52 = vld [vmem:[#allocation24_spill] sm:$0xff] }
  0x98   :  { %v143_v57 = vpop.f32.mrf.mxu0  ;;  %321 = vmatpush.msra.mxu1 %v745_v7  ;;  %375 = vmatpush.msra.mxu3 %v737_v4 }
  0x99   :  { %395 = vmatpush.msrb.mxu0 %v739_v5  ;;  %v1212_v57 = vld [vmem:[#allocation28_spill] sm:$0xff] }
  0x9a   :  { %322 = vmatpush.msra.mxu1 %v767_v15  ;;  %376 = vmatpush.msra.mxu3 %v747_v8 }
  0x9b   :  { %396 = vmatpush.msrb.mxu0 %v749_v9 }
  0x9c   :  { %323 = vmatpush.msra.mxu1 %v780_v19  ;;  %377 = vmatpush.msra.mxu3 %v755_v12 }
  0x9d   :  { %397 = vmatpush.msrb.mxu0 %v763_v14 }
  0x9e   :  { %602 = vmatmul.msk.bf16.vlgmr.msrb.gmra.mxu1 %vm124_vm1, %v760_v13  ;;  %378 = vmatpush.msra.mxu3 %v773_v17 }
  0x9f   :  { %324 = vmatpush.msra.mxu1 %v792_v23  ;;  %398 = vmatpush.msrb.mxu0 %v775_v18 }
  0xa0   :  { %379 = vmatpush.msra.mxu3 %v786_v21 }
  0xa1   :  { %325 = vmatpush.msra.mxu1 %v804_v27  ;;  %399 = vmatpush.msrb.mxu0 %v788_v22 }
  0xa2   :  { %380 = vmatpush.msra.mxu3 %v798_v25 }
  0xa3   :  { %326 = vmatpush.msra.mxu1 %v816_v31  ;;  %400 = vmatpush.msrb.mxu0 %v800_v26 }
  0xa4   :  { %381 = vmatpush.msra.mxu3 %v810_v29 }
  0xa5   :  { %327 = vmatpush.msra.mxu1 %v828_v35  ;;  %401 = vmatpush.msrb.mxu0 %v812_v30 }
  0xa6   :  { %382 = vmatpush.msra.mxu3 %v822_v33 }
  0xa7   :  { %328 = vmatpush.msra.mxu1 %v840_v39  ;;  %402 = vmatpush.msrb.mxu0 %v824_v34 }
  0xa8   :  { %383 = vmatpush.msra.mxu3 %v834_v37 }
  0xa9   :  { %329 = vmatpush.msra.mxu1 %v852_v43  ;;  %403 = vmatpush.msrb.mxu0 %v836_v38 }
  0xaa   :  { %384 = vmatpush.msra.mxu3 %v846_v41 }
  0xab   :  { %330 = vmatpush.msra.mxu1 %v864_v47  ;;  %404 = vmatpush.msrb.mxu0 %v848_v42 }
  0xac   :  { %385 = vmatpush.msra.mxu3 %v858_v45 }
  0xad   :  { %331 = vmatpush.msra.mxu1 %v876_v51  ;;  %405 = vmatpush.msrb.mxu0 %v860_v46 }
  0xae   :  { %386 = vmatpush.msra.mxu3 %v870_v49 }
  0xaf   :  { %332 = vmatpush.msra.mxu1 %v1209_v48  ;;  %406 = vmatpush.msrb.mxu0 %v872_v50 }
  0xb0   :  { %387 = vmatpush.msra.mxu3 %v882_v53 }
  0xb1   :  { %333 = vmatpush.msra.mxu1 %v1210_v52  ;;  %407 = vmatpush.msrb.mxu0 %v884_v54 }
  0xb2   :  { %388 = vmatpush.msra.mxu3 %v901_v58 }
  0xb3   :  { %334 = vmatpush.msra.mxu1 %v1211_v1  ;;  %408 = vmatpush.msrb.mxu0 %v903_v59 }
  0xb4   :  { %389 = vmatpush.msra.mxu3 %v913_v62 }
  0xb5   :  { %335 = vmatpush.msra.mxu1 %v1212_v57  ;;  %409 = vmatpush.msrb.mxu0 %v915_v63 }
  0xb6   :  { %390 = vmatpush.msra.mxu3 %v923_v2 }
  0xb7   :  { %336 = vmatpush.msra.mxu1 %v931_v61  ;;  %410 = vmatpush.msrb.mxu0 %v925_v3  ;;  %v1214_v3 = vld [vmem:[#allocation21_spill] sm:$0xff] }
  0xb9   :  { %415 = vmatpush.msrb.mxu1 %v741_v6  ;;  %v1213_v6 = vld [vmem:[#allocation20_spill] sm:$0xff] }
  0xbb   :  { %416 = vmatpush.msrb.mxu1 %v753_v11 }
  0xbd   :  { %417 = vmatpush.msrb.mxu1 %v769_v16 }
  0xbf   :  { %418 = vmatpush.msrb.mxu1 %v782_v20 }
  0xc1   :  { %419 = vmatpush.msrb.mxu1 %v794_v24 }
  0xc3   :  { %420 = vmatpush.msrb.mxu1 %v806_v28  ;;  %v354_v28 = vld [vmem:[#allocation2 + $0x10] sm:$0xff] }
  0xc5   :  { %421 = vmatpush.msrb.mxu1 %v818_v32  ;;  %v355_v32 = vpack.c.bf16 %v354_v28, %v354_v28 }
  0xc7   :  { %422 = vmatpush.msrb.mxu1 %v830_v36  ;;  %v357_v36 = vsel %vm128_vm0, %v355_v32, 0 }
  0xc8   :  { %366 = vmatpush.bf16.msra.mxu2 %v357_v36 }
  0xc9   :  { %423 = vmatpush.msrb.mxu1 %v842_v40 }
  0xcb   :  { %424 = vmatpush.msrb.mxu1 %v854_v44 }
  0xcd   :  { %425 = vmatpush.msrb.mxu1 %v1213_v6 }
  0xcf   :  { %426 = vmatpush.msrb.mxu1 %v1214_v3 }
  0xd1   :  { %427 = vmatpush.msrb.mxu1 %v890_v56 }
  0xd3   :  { %428 = vmatpush.msrb.mxu1 %v905_v60 }
  0xd5   :  { %429 = vmatpush.msrb.mxu1 %v917_v0 }
  0xd7   :  { %430 = vmatpush.msrb.mxu1 %v929_v10 }
 0x113   :  { %v165_v40 = vpop.f32.mrf.mxu1 }
 0x114   :  { %v225_v24 = vpop.f32.mrf.mxu0 }
 0x115   :  { %v233_v44 = vrot.slane %v225_v24, 4 }
 0x119   :  { %v185_v20 = vpop.f32.mrf.mxu2 }
 0x11a   :  { %v232_v6 = vrot.slane %v185_v20, 4  ;;  %v205_v16 = vpop.f32.mrf.mxu3  ;;  %v1225_v20 = vld [vmem:[#allocation20_spill] sm:$0xff] }
 0x11b   :  { %v235_v3 = vsel %vm128_vm0, %v205_v16, %v233_v44  ;;  %v254_v56 = vpop.f32.mrf.mxu1  ;;  %v1222_v16 = vld [vmem:[#allocation17_spill] sm:$0xff] }
 0x11c   :  { %v234_v60 = vsel %vm128_vm0, %v165_v40, %v232_v6  ;;  %239 = vst [vmem:[#allocation7 + $0x8] sm:$0xff] %v235_v3  ;;  %v255_v0 = vadd.f32 %v254_v56, %v972_v55  ;;  %v1217_v6 = vld [vmem:[#allocation12_spill] sm:$0xff] }
 0x11d   :  { %238 = vst [vmem:[#allocation7] sm:$0xff] %v234_v60 }
 0x11e   :  { %vm258_vm3 = vcmp.gt.f32.partialorder %v255_v0, 0.0  ;;  %v259_v28 = vmul.f32 0.1, %v255_v0 }
 0x120   :  { %v260_v10 = vsel %vm258_vm3, %v255_v0, %v259_v28 }
 0x121   :  { %277 = vmatmul.f32.vlgmr.msrb.gmra.mxu2 %v260_v10  ;;  %297 = vmatmul.f32.vlgmr.msrb.gmra.mxu3 %v260_v10 }
 0x122   :  { %317 = vmatmul.f32.vlgmr.msra.gmra.mxu0 %v260_v10  ;;  %337 = vmatmul.f32.vlgmr.msra.gmra.mxu1 %v260_v10 }
 0x123   :  { %v256_v24 = vpop.f32.mrf.mxu1  ;;  %435 = vmatpush.msrb.mxu2 %v745_v7  ;;  %489 = vmatpush.msra.mxu0 %v737_v4  ;;  %v1215_v4 = vld [vmem:[#allocation29_spill] sm:$0xff] }
 0x124   :  { %509 = vmatpush.msra.mxu1 %v739_v5  ;;  %v1216_v5 = vld [vmem:[#allocation11_spill] sm:$0xff] }
 0x125   :  { %436 = vmatpush.msrb.mxu2 %v767_v15  ;;  %490 = vmatpush.msra.mxu0 %v747_v8  ;;  %v1218_v8 = vld [vmem:[#allocation13_spill] sm:$0xff] }
 0x126   :  { %510 = vmatpush.msra.mxu1 %v749_v9  ;;  %v1219_v9 = vld [vmem:[#allocation14_spill] sm:$0xff] }
 0x127   :  { %437 = vmatpush.msrb.mxu2 %v780_v19  ;;  %491 = vmatpush.msra.mxu0 %v755_v12  ;;  %v1220_v12 = vld [vmem:[#allocation15_spill] sm:$0xff] }
 0x128   :  { %511 = vmatpush.msra.mxu1 %v763_v14  ;;  %v1221_v14 = vld [vmem:[#allocation16_spill] sm:$0xff] }
 0x129   :  { %603 = vmatmul.msk.bf16.vlgmr.msra.gmra.mxu2 %vm124_vm1, %v760_v13  ;;  %492 = vmatpush.msra.mxu0 %v773_v17  ;;  %v1223_v17 = vld [vmem:[#allocation18_spill] sm:$0xff] }
 0x12a   :  { %438 = vmatpush.msrb.mxu2 %v792_v23  ;;  %512 = vmatpush.msra.mxu1 %v775_v18  ;;  %v1224_v18 = vld [vmem:[#allocation19_spill] sm:$0xff] }
 0x12b   :  { %493 = vmatpush.msra.mxu0 %v786_v21  ;;  %v1226_v21 = vld [vmem:[#allocation21_spill] sm:$0xff] }
 0x12c   :  { %439 = vmatpush.msrb.mxu2 %v804_v27  ;;  %513 = vmatpush.msra.mxu1 %v788_v22  ;;  %v1228_v22 = vld [vmem:[#allocation25_spill] sm:$0xff] }
 0x12d   :  { %494 = vmatpush.msra.mxu0 %v798_v25  ;;  %v1229_v25 = vld [vmem:[#allocation27_spill] sm:$0xff] }
 0x12e   :  { %440 = vmatpush.msrb.mxu2 %v816_v31  ;;  %514 = vmatpush.msra.mxu1 %v800_v26  ;;  %v1230_v26 = vld [vmem:[#allocation30_spill] sm:$0xff] }
 0x12f   :  { %495 = vmatpush.msra.mxu0 %v810_v29  ;;  %v468_v29 = vld [vmem:[#allocation2 + $0x18] sm:$0xff] }
 0x130   :  { %441 = vmatpush.msrb.mxu2 %v828_v35  ;;  %515 = vmatpush.msra.mxu1 %v812_v30  ;;  %v469_v30 = vpack.c.bf16 %v468_v29, %v468_v29 }
 0x131   :  { %496 = vmatpush.msra.mxu0 %v822_v33 }
 0x132   :  { %442 = vmatpush.msrb.mxu2 %v840_v39  ;;  %516 = vmatpush.msra.mxu1 %v824_v34  ;;  %v471_v32 = vsel %vm128_vm0, %v469_v30, 0 }
 0x133   :  { %497 = vmatpush.msra.mxu0 %v834_v37  ;;  %480 = vmatpush.bf16.msrb.mxu3 %v471_v32 }
 0x134   :  { %443 = vmatpush.msrb.mxu2 %v852_v43  ;;  %517 = vmatpush.msra.mxu1 %v836_v38 }
 0x135   :  { %498 = vmatpush.msra.mxu0 %v846_v41 }
 0x136   :  { %444 = vmatpush.msrb.mxu2 %v864_v47  ;;  %518 = vmatpush.msra.mxu1 %v848_v42 }
 0x137   :  { %499 = vmatpush.msra.mxu0 %v858_v45 }
 0x138   :  { %445 = vmatpush.msrb.mxu2 %v876_v51  ;;  %519 = vmatpush.msra.mxu1 %v860_v46 }
 0x139   :  { %500 = vmatpush.msra.mxu0 %v870_v49 }
 0x13a   :  { %446 = vmatpush.msrb.mxu2 %v1209_v48  ;;  %520 = vmatpush.msra.mxu1 %v872_v50 }
 0x13b   :  { %501 = vmatpush.msra.mxu0 %v882_v53 }
 0x13c   :  { %447 = vmatpush.msrb.mxu2 %v1210_v52  ;;  %521 = vmatpush.msra.mxu1 %v884_v54 }
 0x13d   :  { %502 = vmatpush.msra.mxu0 %v901_v58 }
 0x13e   :  { %448 = vmatpush.msrb.mxu2 %v1211_v1  ;;  %522 = vmatpush.msra.mxu1 %v903_v59 }
 0x13f   :  { %503 = vmatpush.msra.mxu0 %v913_v62 }
 0x140   :  { %449 = vmatpush.msrb.mxu2 %v1212_v57  ;;  %523 = vmatpush.msra.mxu1 %v915_v63 }
 0x141   :  { %504 = vmatpush.msra.mxu0 %v923_v2 }
 0x142   :  { %450 = vmatpush.msrb.mxu2 %v931_v61  ;;  %524 = vmatpush.msra.mxu1 %v1215_v4 }
 0x144   :  { %529 = vmatpush.msra.mxu2 %v1216_v5 }
 0x146   :  { %530 = vmatpush.msra.mxu2 %v753_v11  ;;  %v1227_v11 = vld [vmem:[#allocation23_spill] sm:$0xff] }
 0x148   :  { %531 = vmatpush.msra.mxu2 %v1217_v6 }
 0x14a   :  { %532 = vmatpush.msra.mxu2 %v1218_v8 }
 0x14c   :  { %533 = vmatpush.msra.mxu2 %v1219_v9 }
 0x14e   :  { %534 = vmatpush.msra.mxu2 %v1220_v12 }
 0x150   :  { %535 = vmatpush.msra.mxu2 %v1221_v14 }
 0x152   :  { %536 = vmatpush.msra.mxu2 %v1222_v16 }
 0x154   :  { %537 = vmatpush.msra.mxu2 %v1223_v17 }
 0x156   :  { %538 = vmatpush.msra.mxu2 %v1224_v18 }
 0x158   :  { %539 = vmatpush.msra.mxu2 %v1225_v20 }
 0x15a   :  { %540 = vmatpush.msra.mxu2 %v1226_v21 }
 0x15c   :  { %541 = vmatpush.msra.mxu2 %v1227_v11 }
 0x15e   :  { %542 = vmatpush.msra.mxu2 %v1228_v22 }
 0x160   :  { %543 = vmatpush.msra.mxu2 %v1229_v25 }
 0x162   :  { %544 = vmatpush.msra.mxu2 %v1230_v26 }
 0x19f   :  { %v338_v33 = vpop.f32.mrf.mxu1  ;;  %v318_v36 = vpop.f32.mrf.mxu0 }
 0x1a0   :  { %v346_v34 = vrot.slane %v338_v33, 4 }
 0x1a2   :  { %v348_v37 = vsel %vm128_vm0, %v318_v36, %v346_v34 }
 0x1a3   :  { %352 = vst [vmem:[#allocation7 + $0x18] sm:$0xff] %v348_v37 }
 0x1a4   :  { %v278_v38 = vpop.f32.mrf.mxu2  ;;  %v298_v40 = vpop.f32.mrf.mxu3 }
 0x1a5   :  { %v345_v41 = vrot.slane %v298_v40, 4 }
 0x1a7   :  { %v347_v42 = vsel %vm128_vm0, %v278_v38, %v345_v41 }
 0x1a8   :  { %351 = vst [vmem:[#allocation7 + $0x10] sm:$0xff] %v347_v42 }
 0x1ac   :  { %v368_v44 = vpop.f32.mrf.mxu2 }
 0x1ad   :  { %v369_v45 = vadd.f32 %v368_v44, %v972_v55 }
 0x1af   :  { %vm372_vm4 = vcmp.gt.f32.partialorder %v369_v45, 0.0  ;;  %v373_v46 = vmul.f32 0.1, %v369_v45 }
 0x1b1   :  { %v374_v49 = vsel %vm372_vm4, %v369_v45, %v373_v46 }
 0x1b2   :  { %391 = vmatmul.f32.vlgmr.msra.gmra.mxu3 %v374_v49  ;;  %411 = vmatmul.f32.vlgmr.msrb.gmra.mxu0 %v374_v49 }
 0x1b3   :  { %431 = vmatmul.f32.vlgmr.msrb.gmra.mxu1 %v374_v49  ;;  %451 = vmatmul.f32.vlgmr.msrb.gmra.mxu2 %v374_v49 }
 0x1b4   :  { %v370_v50 = vpop.f32.mrf.mxu2  ;;  %549 = vmatpush.msra.mxu3 %v745_v7 }
 0x1b6   :  { %550 = vmatpush.msra.mxu3 %v767_v15 }
 0x1b8   :  { %551 = vmatpush.msra.mxu3 %v780_v19 }
 0x1ba   :  { %604 = vmatmul.msk.bf16.vlgmr.msrb.gmra.mxu3 %vm124_vm1, %v760_v13 }
 0x1bb   :  { %552 = vmatpush.msra.mxu3 %v792_v23 }
 0x1bd   :  { %553 = vmatpush.msra.mxu3 %v804_v27 }
 0x1bf   :  { %554 = vmatpush.msra.mxu3 %v816_v31 }
 0x1c1   :  { %555 = vmatpush.msra.mxu3 %v828_v35 }
 0x1c3   :  { %556 = vmatpush.msra.mxu3 %v840_v39 }
 0x1c5   :  { %557 = vmatpush.msra.mxu3 %v852_v43 }
 0x1c7   :  { %558 = vmatpush.msra.mxu3 %v864_v47 }
 0x1c9   :  { %559 = vmatpush.msra.mxu3 %v876_v51 }
 0x1cb   :  { %560 = vmatpush.msra.mxu3 %v1209_v48 }
 0x1cd   :  { %561 = vmatpush.msra.mxu3 %v1210_v52 }
 0x1cf   :  { %562 = vmatpush.msra.mxu3 %v1211_v1 }
 0x1d1   :  { %563 = vmatpush.msra.mxu3 %v1212_v57 }
 0x1d3   :  { %564 = vmatpush.msra.mxu3 %v931_v61 }
 0x22f   :  { %v412_v7 = vpop.f32.mrf.mxu0 }
 0x230   :  { %v459_v13 = vrot.slane %v412_v7, 4  ;;  %v432_v31 = vpop.f32.mrf.mxu1 }
 0x235   :  { %v392_v15 = vpop.f32.mrf.mxu3 }
 0x236   :  { %v461_v19 = vsel %vm128_vm0, %v392_v15, %v459_v13  ;;  %v452_v23 = vpop.f32.mrf.mxu2 }
 0x237   :  { %466 = vst [vmem:[#allocation7 + $0x20] sm:$0xff] %v461_v19  ;;  %v460_v27 = vrot.slane %v452_v23, 4 }
 0x239   :  { %v462_v35 = vsel %vm128_vm0, %v432_v31, %v460_v27 }
 0x23a   :  { %467 = vst [vmem:[#allocation7 + $0x28] sm:$0xff] %v462_v35 }
 0x23d   :  { %v482_v39 = vpop.f32.mrf.mxu3 }
 0x23e   :  { %v483_v43 = vadd.f32 %v482_v39, %v972_v55 }
 0x240   :  { %vm486_vm5 = vcmp.gt.f32.partialorder %v483_v43, 0.0  ;;  %v487_v47 = vmul.f32 0.1, %v483_v43 }
 0x242   :  { %v488_v51 = vsel %vm486_vm5, %v483_v43, %v487_v47 }
 0x243   :  { %505 = vmatmul.f32.vlgmr.msra.gmra.mxu0 %v488_v51  ;;  %525 = vmatmul.f32.vlgmr.msra.gmra.mxu1 %v488_v51 }
 0x244   :  { %545 = vmatmul.f32.vlgmr.msra.gmra.mxu2 %v488_v51  ;;  %565 = vmatmul.f32.vlgmr.msra.gmra.mxu3 %v488_v51 }
 0x245   :  { %v484_v53 = vpop.f32.mrf.mxu3 }
 0x2c0   :  { %v526_v54 = vpop.f32.mrf.mxu1  ;;  %v506_v58 = vpop.f32.mrf.mxu0 }
 0x2c1   :  { %v573_v56 = vrot.slane %v526_v54, 4 }
 0x2c3   :  { %v575_v59 = vsel %vm128_vm0, %v506_v58, %v573_v56 }
 0x2c4   :  { %579 = vst [vmem:[#allocation7 + $0x30] sm:$0xff] %v575_v59 }
 0x2c7   :  { %v566_v60 = vpop.f32.mrf.mxu3  ;;  %v546_v62 = vpop.f32.mrf.mxu2 }
 0x2c8   :  { %v574_v61 = vrot.slane %v566_v60, 4 }
 0x2ca   :  { %v576_v63 = vsel %vm128_vm0, %v546_v62, %v574_v61 }
 0x2cb   :  { %580 = vst [vmem:[#allocation7 + $0x38] sm:$0xff] %v576_v63 }
 0x2cc   :  { %593 = dma.vmem_to_hbm [thread:$0]  %s586_s30, 1024, %s588_s7, [#allocation4], %s696_s27, %s696_s27, %s697_s28  }
 0x2cd   :  { %690 = dma.done.wait [#allocation4], 1024  }
 0x2ce   :  { %691 = vsyncadd [#allocation4], 4294966272 }
 0x2cf   :  { %598 = vsyncpa [#allocation3], 1 }
 0x2d0   :  { %599 = vsyncpa [#allocation6], 1 }
 0x2d1   :  { %600 = vsyncpa [#allocation4], 1 }

</bundles_post_ra>
